<compile_context>
chip_gen: v6e
topology: v6e:2x2x1
jax: 0.10.0
libtpu: 0.0.40
codegen_flags: <defaults>
</compile_context>

<pallas_src>
import functools

import jax
import jax.numpy as jnp
from jax.experimental import pallas as pl
from jax.experimental.pallas import tpu as pltpu


@functools.lru_cache(maxsize=None)
def _roll_matches_jnp():
    """pltpu.roll is documented to match jnp.roll (elements move toward higher
    indices for positive shift).  Probe the compiled semantics once so the
    3x3-conv tap shifts cannot silently flip direction."""
    def kernel(x_ref, o_ref):
        o_ref[...] = pltpu.roll(x_ref[...], shift=1, axis=1)

    x = jnp.tile(jnp.arange(128, dtype=jnp.float32)[None, :], (8, 1))
    out = jax.device_get(pl.pallas_call(
        kernel, out_shape=jax.ShapeDtypeStruct((8, 128), jnp.float32))(x))
    if out[0, 0] == 127.0:      # jnp.roll semantics: out[i] = x[(i - shift) % N]
        return True
    if out[0, 0] == 1.0:        # flipped semantics:  out[i] = x[(i + shift) % N]
        return False
    raise RuntimeError(f"unexpected pltpu.roll behaviour: out[0,:4]={out[0, :4]}")


def _correlation_kernel(x_rgb_ref, x_dep_ref, pool_t_ref,
                        w_red1_ref, b_red1_ref,
                        w_red2s_ref, b_red2_ref,
                        w_adapt_ref, b_adapt_ref,
                        new_feat_ref, depth_feat_ref,
                        *, H, W, bblk, compute_dtype, roll_matches_jnp):
    HW = H * W
    f32 = jnp.float32
    cast = lambda a: a.astype(compute_dtype)

    # Parameters: read once per grid step, shared by all bblk batch elements.
    pool_t = pool_t_ref[...]          # (K, HW)   compute dtype
    w_red1 = w_red1_ref[...]          # (C, K)    compute dtype
    b_red1 = b_red1_ref[...]          # (C, 1)    f32
    w_red2s = w_red2s_ref[...]        # (C, 9C)   compute dtype (tap-stacked)
    b_red2 = b_red2_ref[...]          # (C, 1)    f32
    w_adapt = w_adapt_ref[...]        # (C, 2C)   compute dtype
    b_adapt = b_adapt_ref[...]        # (C, 1)    f32

    # 3x3-conv edge-validity masks, hoisted out of the tap loop (and shared by
    # every batch element): boolean (1, HW) vectors combined per tap.
    pos = jax.lax.broadcasted_iota(jnp.int32, (1, HW), 1)
    row, col = pos // W, pos % W
    row_ok = {-1: row >= 1, 0: None, 1: row <= H - 2}
    col_ok = {-1: col >= 1, 0: None, 1: col <= W - 2}
    taps = []                         # (flat shift, combined boolean mask | None)
    for ky in range(3):
        for kx in range(3):
            dy, dx = ky - 1, kx - 1
            m = row_ok[dy]
            if col_ok[dx] is not None:
                m = col_ok[dx] if m is None else jnp.logical_and(m, col_ok[dx])
            taps.append((dy * W + dx, m))

    def l2_normalize(v, axis):
        # F.normalize: v / max(||v||, 1e-12)  ==  v * rsqrt(max(sum(v^2), 1e-24))
        return v * jax.lax.rsqrt(
            jnp.maximum(jnp.sum(v * v, axis=axis, keepdims=True), 1e-24))

    def instance_norm(v, eps=1e-5):   # per-channel over the spatial axis
        m = jnp.mean(v, axis=1, keepdims=True)
        c = v - m
        var = jnp.mean(c * c, axis=1, keepdims=True)
        return c * jax.lax.rsqrt(var + eps)

    dn_bt = (((1,), (1,)), ((), ()))  # contract last axis of both (A @ B^T)

    for b in range(bblk):
        x_rgb = x_rgb_ref[b]          # (C, HW) f32
        x_dep = x_dep_ref[b]
        rgb_c, dep_c = cast(x_rgb), cast(x_dep)

        # -- AdaptiveAvgPool2d as a matmul with the constant pooling matrix,
        #    then F.normalize over channels -> per-block kernels (K, C).
        ker_rgb = l2_normalize(
            jax.lax.dot_general(pool_t, rgb_c, dn_bt,
                                preferred_element_type=f32), axis=1)
        ker_dep = l2_normalize(
            jax.lax.dot_general(pool_t, dep_c, dn_bt,
                                preferred_element_type=f32), axis=1)

        # -- Fold the corr_reduce 1x1 conv into the correlation:
        #    w_red1 @ (ker @ feat_n) == (w_red1 @ ker) @ feat_n  (tiny matmuls).
        wk_rgb = cast(jnp.dot(w_red1, cast(ker_rgb), preferred_element_type=f32))
        wk_dep = cast(jnp.dot(w_red1, cast(ker_dep), preferred_element_type=f32))

        rgb_n = cast(l2_normalize(x_rgb, axis=0))      # (C, HW)
        dep_n = cast(l2_normalize(x_dep, axis=0))

        red = 0.5 * (jnp.dot(wk_rgb, rgb_n, preferred_element_type=f32) +
                     jnp.dot(wk_dep, dep_n, preferred_element_type=f32)) + b_red1
        h = cast(jnp.maximum(instance_norm(red), 0.0))  # (C, HW)

        # -- 3x3 conv (padding=1) as ONE deep matmul over a 9-tap im2col stack:
        #    each tap is an XLU roll of the flattened plane + edge mask,
        #    stacked along the contraction axis -> (9C, HW).
        planes = []
        for s, m in taps:
            if s == 0:
                sh = h
            else:
                amt = (-s if roll_matches_jnp else s) % HW
                sh = pltpu.roll(h, shift=amt, axis=1)   # sh[p] = h[p + s]
            if m is not None:
                sh = jnp.where(m, sh, jnp.zeros((), compute_dtype))
            planes.append(sh)
        stack = jnp.concatenate(planes, axis=0)         # (9C, HW)
        red_corr = jnp.dot(w_red2s, stack, preferred_element_type=f32) + b_red2

        # -- feat_adapt: 1x1 conv over concat([rgb, Red_corr], channel) -> ReLU.
        cat = jnp.concatenate([rgb_c, cast(red_corr)], axis=0)   # (2C, HW)
        new_feat = jnp.dot(w_adapt, cat, preferred_element_type=f32) + b_adapt
        new_feat_ref[b] = jnp.maximum(new_feat, 0.0).astype(new_feat_ref.dtype)

        # -- Dnorm: InstanceNorm of the raw depth features (pure f32 path).
        depth_feat_ref[b] = instance_norm(x_dep).astype(depth_feat_ref.dtype)


def _auto_batch_block(n):
    # Prefer keeping >= 2 grid steps (v7x has two TensorCores and the grid
    # axis is "parallel"); within that, pack up to 4 batch elements per step
    # to amortize per-step overhead on single-TC v5e/v6e.
    for blk in (4, 2, 1):
        if n % blk == 0 and n // blk >= 2:
            return blk
    # TODO(synk): if N == 1 on v7x, add a second parallel grid axis (e.g. split
    # the weight-shared matmuls over HW) so the second TensorCore gets work.
    return 1


def correlation_layer_forward(x_rgb, x_dep, params, corr_size, *,
                              batch_block=None, use_bf16_matmuls=True):
    """x_rgb, x_dep: (N, C, H, W) float32. Returns (new_feat, Depth_feat) NCHW."""
    N, C, H, W = x_rgb.shape
    # TODO(synk): AdaptiveAvgPool2d with H, W not divisible by corr_size
    # (non-uniform bins) is not implemented; exact block-average case only.
    assert H % corr_size == 0 and W % corr_size == 0
    HW = H * W
    cs = corr_size
    K = cs * cs

    compute_dtype = jnp.bfloat16 if use_bf16_matmuls else jnp.float32
    bblk = _auto_batch_block(N) if batch_block is None else batch_block
    assert N % bblk == 0
    grid_n = N // bblk

    # Channel-major, lane-dense: NCHW -> (N, C, HW) is a pure reshape.
    xr = x_rgb.reshape(N, C, HW).astype(jnp.float32)
    xd = x_dep.reshape(N, C, HW).astype(jnp.float32)

    # Constant pooling matrix: pool_t[k, p] = 1/block_size iff flat position p
    # falls in adaptive-avg-pool block k (row-major blocks, matching torch's
    # .view(C, cs*cs) flattening in corr_fun).
    p_idx = jnp.arange(HW, dtype=jnp.int32)
    blk_id = (p_idx // W) // (H // cs) * cs + (p_idx % W) // (W // cs)
    pool_t = ((jnp.arange(K, dtype=jnp.int32)[:, None] == blk_id[None, :])
              .astype(jnp.float32) / float((H // cs) * (W // cs)))   # (K, HW)

    # 3x3 conv weight restacked to (C_out, 9*C_in) with tap index t = ky*3+kx,
    # matching the in-kernel (9C, HW) im2col stack.
    w_red2s = jnp.transpose(params["w_red2"], (0, 2, 3, 1)).reshape(C, 9 * C)

    cd = lambda a: a.astype(compute_dtype)
    as_col = lambda v: v.reshape(-1, 1).astype(jnp.float32)

    def batch_spec(shape):            # bblk batch elements per grid step
        zeros = (0,) * len(shape)
        return pl.BlockSpec((bblk,) + shape, lambda n: (n,) + zeros)

    def rep_spec(shape):              # small parameter, same block every step
        zeros = (0,) * len(shape)
        return pl.BlockSpec(shape, lambda n: zeros)

    kernel = functools.partial(
        _correlation_kernel, H=H, W=W, bblk=bblk, compute_dtype=compute_dtype,
        roll_matches_jnp=_roll_matches_jnp())

    new_feat, depth_feat = pl.pallas_call(
        kernel,
        out_shape=(jax.ShapeDtypeStruct((N, C, HW), jnp.float32),
                   jax.ShapeDtypeStruct((N, C, HW), jnp.float32)),
        grid_spec=pltpu.PrefetchScalarGridSpec(
            num_scalar_prefetch=0,
            grid=(grid_n,),
            in_specs=[
                batch_spec((C, HW)),        # RGB features
                batch_spec((C, HW)),        # depth features
                rep_spec((K, HW)),          # pooling matrix
                rep_spec((C, K)),           # corr_reduce 1x1 conv weight
                rep_spec((C, 1)),           # corr_reduce 1x1 conv bias
                rep_spec((C, 9 * C)),       # corr_reduce 3x3 conv weight (stacked)
                rep_spec((C, 1)),           # corr_reduce 3x3 conv bias
                rep_spec((C, 2 * C)),       # feat_adapt 1x1 conv weight
                rep_spec((C, 1)),           # feat_adapt bias
            ],
            out_specs=[batch_spec((C, HW)), batch_spec((C, HW))],
        ),
        compiler_params=pltpu.CompilerParams(
            dimension_semantics=("parallel",)),     # megacore / v7x dual-TC
    )(xr, xd, cd(pool_t),
      cd(params["w_red1"]), as_col(params["b_red1"]),
      cd(w_red2s), as_col(params["b_red2"]),
      cd(params["w_adapt"]), as_col(params["b_adapt"]))

    return new_feat.reshape(N, C, H, W), depth_feat.reshape(N, C, H, W)


def correlation_layer_reference(x_rgb, x_dep, params, corr_size):
    """Pure-JAX reference mirroring the PyTorch forward (correctness check)."""
    N, C, H, W = x_rgb.shape
    cs = corr_size
    K = cs * cs

    def l2norm_channels(v):
        n = jnp.sqrt(jnp.sum(v * v, axis=1, keepdims=True))
        return v / jnp.maximum(n, 1e-12)

    def adaptive_pool(v):
        return v.reshape(N, C, cs, H // cs, cs, W // cs).mean(axis=(3, 5))

    def instance_norm(v, eps=1e-5):
        m = v.mean(axis=(2, 3), keepdims=True)
        c = v - m
        var = (c * c).mean(axis=(2, 3), keepdims=True)
        return c * jax.lax.rsqrt(var + eps)

    def corr(feat):
        ker = l2norm_channels(adaptive_pool(feat)).reshape(N, C, K)
        fea = l2norm_channels(feat).reshape(N, C, H * W)
        return jnp.einsum("nck,ncp->nkp", ker, fea)

    corr_avg = 0.5 * (corr(x_rgb) + corr(x_dep))
    corr_avg = corr_avg.reshape(N, K, H, W)

    red = jnp.einsum("ok,nkhw->nohw", params["w_red1"], corr_avg)
    red = red + params["b_red1"][None, :, None, None]
    red = jnp.maximum(instance_norm(red), 0.0)

    red_p = jnp.pad(red, ((0, 0), (0, 0), (1, 1), (1, 1)))
    acc = jnp.zeros((N, C, H, W), jnp.float32)
    w2 = params["w_red2"]
    for ky in range(3):
        for kx in range(3):
            acc = acc + jnp.einsum("oc,nchw->nohw", w2[:, :, ky, kx],
                                   red_p[:, :, ky:ky + H, kx:kx + W])
    red_corr = acc + params["b_red2"][None, :, None, None]

    cat = jnp.concatenate([x_rgb, red_corr], axis=1)
    new_feat = jnp.einsum("oc,nchw->nohw", params["w_adapt"], cat)
    new_feat = jnp.maximum(new_feat + params["b_adapt"][None, :, None, None], 0.0)
    depth_feat = instance_norm(x_dep)
    return new_feat, depth_feat


if __name__ == "__main__":
    key = jax.random.PRNGKey(0)
    ks = jax.random.split(key, 10)

    C, H, W = 32, 16, 16              # feat_channel = 32
    corr_size = 4                     # global `corr_size` in the original code
    K = corr_size * corr_size

    params = {
        "w_red1": 0.2 * jax.random.normal(ks[2], (C, K), jnp.float32),
        "b_red1": 0.1 * jax.random.normal(ks[3], (C,), jnp.float32),
        "w_red2": 0.1 * jax.random.normal(ks[4], (C, C, 3, 3), jnp.float32),
        "b_red2": 0.1 * jax.random.normal(ks[5], (C,), jnp.float32),
        "w_adapt": 0.1 * jax.random.normal(ks[6], (C, 2 * C), jnp.float32),
        "b_adapt": 0.1 * jax.random.normal(ks[7], (C,), jnp.float32),
    }

    def run_case(n, batch_block, use_bf16, tol, k_rgb, k_dep):
        x_rgb = jax.random.normal(k_rgb, (n, C, H, W), jnp.float32)
        x_dep = jax.random.normal(k_dep, (n, C, H, W), jnp.float32)
        nf, df = correlation_layer_forward(
            x_rgb, x_dep, params, corr_size,
            batch_block=batch_block, use_bf16_matmuls=use_bf16)
        nf, df = jax.block_until_ready(nf), jax.block_until_ready(df)
        rnf, rdf = correlation_layer_reference(x_rgb, x_dep, params, corr_size)
        assert nf.shape == (n, C, H, W) and df.shape == (n, C, H, W)
        err_nf = float(jnp.max(jnp.abs(nf - rnf)))
        assert jnp.allclose(nf, rnf, atol=tol, rtol=tol), (
            f"new_feat mismatch (N={n}, bblk={batch_block}, bf16={use_bf16}, "
            f"max_abs_err={err_nf:.3e})")
        assert jnp.allclose(df, rdf, atol=2e-3, rtol=2e-3), (
            f"Depth_feat mismatch (N={n}, bblk={batch_block}, bf16={use_bf16})")

    # 1) Default optimized path: bf16 MXU operands, one batch per grid step
    #    (grid length 2 so the second v7x TensorCore always has work).
    run_case(2, None, True, 5e-2, ks[0], ks[1])
    # 2) Exact-f32 MXU path: tight tolerance against the PyTorch-equivalent ref.
    run_case(2, None, False, 2e-3, ks[0], ks[1])
    # 3) Batch-blocked path (2 batch elements per grid step) for 1-TC chips.
    run_case(4, 2, True, 5e-2, ks[8], ks[9])

    print("KERNEL_OK")
</pallas_src>

<mosaic_0001>
module attributes {stable_mosaic.version = 11 : i64} {
  func.func @kernel(%arg0: memref<8x128xf32, #tpu.memory_space<vmem>>, %arg1: memref<8x128xf32, #tpu.memory_space<vmem>>) attributes {dimension_semantics = [], scalar_prefetch = 0 : i64, scratch_operands = 0 : i64, tpu.core_type = #tpu.core_type<tc>} {
    %c0 = arith.constant 0 : index
    %c0_0 = arith.constant 0 : index
    %0 = vector.load %arg0[%c0, %c0_0] : memref<8x128xf32, #tpu.memory_space<vmem>>, vector<8x128xf32>
    %c1_i32 = arith.constant 1 : i32
    %1 = tpu.dynamic_rotate %0 by %c1_i32 dim 1 : vector<8x128xf32>, i32 -> vector<8x128xf32>
    %c0_1 = arith.constant 0 : index
    %c0_2 = arith.constant 0 : index
    %2 = vector.load %arg1[%c0_1, %c0_2] : memref<8x128xf32, #tpu.memory_space<vmem>>, vector<8x128xf32>
    tpu.vector_store %arg1[%c0_1, %c0_2], %1 {strides = array<i32>} : memref<8x128xf32, #tpu.memory_space<vmem>>, vector<8x128xf32>,
    return
  }
}

</mosaic_0001>

<bundles_post_ra>
// kernel: tpu_custom_call.1
= control target key start
LH: loop header
LB: loop body
LE: loop exit
PB: predicated region body
PF: predicated region fallthrough
CT: control target
= control target key end

     0   :  { %6 = vsyncpa [#allocation3], 0  ;;  %s106_s0 = inlined_call_operand.hbm [shape: f32[8,128], index: 0, kind: input, shape index: {}]   ;;  %s107_s1 = inlined_call_operand.hbm [shape: f32[8,128], index: 1, kind: output, shape index: {}]  }
   0x1   :  { %7 = vsyncpa [#allocation4], 0  ;;  %s87_s6 = smov [#allocation2]  }
   0x2   :  { %s14_s7 = sshll.u32 %s87_s6, 4  ;;  %s15_s7 = int_to_ptr.vmem [resolvable:$true] %s14_s7 }
   0x3   :  { %s51_s8 = scalar_lea.vmem %s15_s7, 128  ;;  %p56_p1 = scmp.lt.s32.totalorder %s15_s7, %s15_s7 }
   0x4   :  { %p52_p0 = scmp.ne.s32.totalorder %s15_s7, %s51_s8  ;;  %p57_p2 = scmp.lt.s32.totalorder %s51_s8, %s51_s8 }
   0x6   :  { %p58_p3 = por %p57_p2, %p56_p1 }
   0x8   :  { %p59_p4 = pnand %p58_p3, %p52_p0 }
   0xa   :  { %62 = shalt.err (!%p59_p4)
}
   0xb   :  { %17 = dma.hbm_to_vmem [thread:$0]  %s106_s0, 128, %s15_s7, [#allocation3]  }
   0xc   :  { %83 = dma.done.wait [#allocation3], 128  }
   0xd   :  { %84 = vsyncadd [#allocation3], 4294967168  ;;  %v21_v0 = vld [vmem:[#allocation2] sm:$0xff]  ;;  %s88_s11 = smov 1   ;;  %s89_s12 = smov [#allocation5]  }
   0xe   :  { %22 = vrot.lane.b32.xlu0 %v21_v0, %s88_s11  ;;  %s31_s13 = sshll.u32 %s89_s12, 4  ;;  %s32_s13 = int_to_ptr.vmem [resolvable:$true] %s31_s13 }
   0xf   :  { %s63_s14 = scalar_lea.vmem %s32_s13, 128  ;;  %p68_p6 = scmp.lt.s32.totalorder %s32_s13, %s32_s13 }
  0x10   :  { %p64_p5 = scmp.ne.s32.totalorder %s32_s13, %s63_s14  ;;  %p69_p7 = scmp.lt.s32.totalorder %s63_s14, %s63_s14 }
  0x12   :  { %p70_p8 = por %p69_p7, %p68_p6 }
  0x14   :  { %p71_p9 = pnand %p70_p8, %p64_p5 }
  0x80   :  { %v23_v1 = vpop.permute.xlu0 %22 }
  0x81   :  { %24 = vst [vmem:[#allocation5] sm:$0xff] %v23_v1 }
  0x82   :  { %74 = shalt.err (!%p71_p9)
}
  0x83   :  { %34 = dma.vmem_to_hbm [thread:$0]  %s32_s13, 128, %s107_s1, [#allocation4]  }
  0x84   :  { %85 = dma.done.wait [#allocation4], 128  }
  0x85   :  { %86 = vsyncadd [#allocation4], 4294967168 }
  0x86   :  { %38 = vsyncpa [#allocation3], 1 }
  0x87   :  { %39 = vsyncpa [#allocation4], 1 }

</bundles_post_ra>
